<compile_context>
chip_gen: v7x
topology: tpu7x:2x2x1
jax: 0.10.0
libtpu: 0.0.40
codegen_flags: <defaults>
</compile_context>

<pallas_src>
import functools

import jax
import jax.numpy as jnp
from jax import lax
from jax.experimental import pallas as pl
from jax.experimental.pallas import tpu as pltpu

EPS = 1e-8


def _inv_l2norm(x, axis):
    # 1 / (||x|| + eps) via a single EUP rsqrt; eps folded under the sqrt (== eps**2),
    # identical to the PyTorch placement for zero vectors and negligible otherwise.
    return lax.rsqrt(jnp.sum(x * x, axis=axis, keepdims=True) + EPS * EPS)


def _alignment_kernel(q_ref, c_ref, m_ref, wt_ref, b_ref, o_ref, *,
                      smooth, sub, n_sub, lq, d, sim_p, use_max_sub):
    # Resident MXU weight (bf16) and bias (f32); constant index_map => no re-DMA.
    wt = wt_ref[...]                           # (D, SIM_p) bf16
    b = b_ref[...]                             # (1, SIM_p) f32

    def _chunk(i):
        off = pl.multiple_of(i * sub, sub)
        # Elementwise / softmax math in f32 (v5e-safe); MXU operands in bf16.
        q = q_ref[pl.ds(off, sub)].astype(jnp.float32)        # (sub, Lq, D)
        m = m_ref[pl.ds(off, sub)].astype(jnp.float32)        # (sub, Lq, D)
        c_bf = c_ref[pl.ds(off, sub)].astype(jnp.bfloat16)    # (sub, Ls, D)

        # --- cross_attention ---------------------------------------------------
        qm_bf = (q * m).astype(jnp.bfloat16)
        # scores (sub, Lq, Ls): contract over D, batch over sub -> no explicit transposes
        s = lax.dot_general(qm_bf, c_bf,
                            dimension_numbers=(((2,), (2,)), ((0,), (0,))),
                            preferred_element_type=jnp.float32)
        s = jnp.where(s > 0, s, 0.1 * s)                      # LeakyReLU(0.1)
        # PyTorch l2norm over dim=-1 of the (Ls, Lq) scores == axis=1 (Lq) here.
        # `smooth` is folded into the small (sub, 1, Ls) inverse norm.
        logits = s * (_inv_l2norm(s, axis=1) * smooth)
        if use_max_sub:
            # Only needed for very large |smooth|: after the l2norm |logits| <= |smooth|.
            logits = logits - jnp.max(logits, axis=-1, keepdims=True)
        e = jnp.exp(logits)
        attn = e * pl.reciprocal(jnp.sum(e, axis=-1, keepdims=True), approx=True)
        # weighted context: (sub, Lq, Ls) x (sub, Ls, D) -> (sub, Lq, D)
        wctx = lax.dot_general(attn.astype(jnp.bfloat16), c_bf,
                               dimension_numbers=(((2,), (1,)), ((0,), (0,))),
                               preferred_element_type=jnp.float32)
        wctx = wctx * _inv_l2norm(wctx, axis=-1)

        # --- similarity representation ------------------------------------------
        diff = q - wctx
        diff = diff * diff                                    # (sub, Lq, D)
        # One flattened (sub*Lq, D) x (D, SIM_p) MXU pass (layout-free: D stays lane dim).
        diff2d = diff.reshape(sub * lq, d).astype(jnp.bfloat16)
        sim = lax.dot_general(diff2d, wt,
                              dimension_numbers=(((1,), (0,)), ((), ())),
                              preferred_element_type=jnp.float32) + b
        # Padded SIM columns have zero weight & bias -> contribute exactly 0 to the norm.
        sim = sim * _inv_l2norm(sim, axis=-1)
        o_ref[pl.ds(off, sub)] = sim.reshape(sub, lq, sim_p).astype(o_ref.dtype)

    if n_sub == 1:
        _chunk(0)
    else:
        def _body(i, carry):
            _chunk(i)
            return carry
        lax.fori_loop(0, n_sub, _body, 0, unroll=(n_sub <= 8))


def alignment_vector(query, context, matrix, smooth, weight, bias,
                     *, block_b=32, sub_b=8):
    B, Lq, D = query.shape
    _, Ls, _ = context.shape
    SIM = weight.shape[0]
    SIMp = pl.cdiv(SIM, 128) * 128              # lane-dense (unmasked) output stores
    itemsize = jnp.dtype(query.dtype).itemsize

    # Per-step batch block: keep >= ~8 grid steps (>= 4 per TC on dual-TC v7x) when B
    # allows; round to a multiple of the in-kernel sub-chunk so every chunk is full.
    Bb = max(1, min(int(block_b), pl.cdiv(B, 8)))
    sub = max(1, min(int(sub_b), Bb))
    Bb = pl.cdiv(Bb, sub) * sub

    # Explicit VMEM budget (v7x: 64 MiB physical, 32 MiB scoped default):
    # double-buffered q/m/c/out blocks + resident weight/bias.
    def _block_bytes(bb):
        io = 2 * bb * (2 * Lq * D + Ls * D) * itemsize
        out = 2 * bb * Lq * SIMp * itemsize
        return io + out + D * SIMp * 2 + SIMp * 4
    while Bb > sub and _block_bytes(Bb) > 24 * 1024 * 1024:
        Bb -= sub

    n_sub = Bb // sub
    n_steps = pl.cdiv(B, Bb)
    Bp = n_steps * Bb
    if Bp != B:
        pad = ((0, Bp - B), (0, 0), (0, 0))
        query = jnp.pad(query, pad)
        context = jnp.pad(context, pad)
        matrix = jnp.pad(matrix, pad)

    # nn.Linear weight (SIM, D) -> (D, SIM_p) bf16 MXU operand; zero-padded columns.
    wt = jnp.zeros((D, SIMp), jnp.bfloat16).at[:, :SIM].set(
        jnp.asarray(weight, jnp.float32).T.astype(jnp.bfloat16))
    bias2d = jnp.zeros((1, SIMp), jnp.float32).at[0, :SIM].set(
        jnp.asarray(bias, jnp.float32))

    # TODO(synk): `smooth` is a trace-time constant (recompiles per distinct value);
    # plumb it through SMEM if it varies at runtime.
    kernel = functools.partial(
        _alignment_kernel, smooth=float(smooth), sub=sub, n_sub=n_sub,
        lq=Lq, d=D, sim_p=SIMp, use_max_sub=abs(float(smooth)) > 60.0)

    out = pl.pallas_call(
        kernel,
        out_shape=jax.ShapeDtypeStruct((Bp, Lq, SIMp), query.dtype),
        grid=(n_steps,),
        in_specs=[
            pl.BlockSpec((Bb, Lq, D), lambda i: (i, 0, 0)),     # query
            pl.BlockSpec((Bb, Ls, D), lambda i: (i, 0, 0)),     # context
            pl.BlockSpec((Bb, Lq, D), lambda i: (i, 0, 0)),     # matrix
            pl.BlockSpec((D, SIMp), lambda i: (0, 0)),          # weight.T (resident)
            pl.BlockSpec((1, SIMp), lambda i: (0, 0)),          # bias (resident)
        ],
        out_specs=pl.BlockSpec((Bb, Lq, SIMp), lambda i: (i, 0, 0)),
        compiler_params=pltpu.CompilerParams(
            dimension_semantics=("parallel",),
            vmem_limit_bytes=40 * 1024 * 1024),
    )(query, context, matrix, wt, bias2d)

    if Bp != B or SIMp != SIM:
        out = out[:B, :, :SIM]
    return out


# ----- pure-JAX reference (mirrors the PyTorch module, full f32) ---------------
def _l2norm(x, axis=-1):
    return x / (jnp.sqrt(jnp.sum(x * x, axis=axis, keepdims=True)) + EPS)


def _reference(query, context, matrix, smooth, weight, bias):
    qm = query * matrix
    attn = jnp.einsum("bsd,bqd->bsq", context, qm)
    attn = jnp.where(attn > 0, attn, 0.1 * attn)
    attn = _l2norm(attn, axis=-1)
    attn = jnp.swapaxes(attn, 1, 2)                       # (B, Lq, Ls)
    attn = jax.nn.softmax(attn * smooth, axis=2)
    wctx = jnp.einsum("bqs,bsd->bqd", attn, context)
    wctx = _l2norm(wctx, axis=-1)
    sim = (query - wctx) ** 2
    sim = jnp.einsum("bqd,od->bqo", sim, weight) + bias
    return _l2norm(sim, axis=-1)


if __name__ == "__main__":
    B, Lq, Ls = 2, 8, 16
    D, SIM = 32, 32          # embed_dim, sim_dim
    smooth = 9.0

    key = jax.random.PRNGKey(0)
    kq, kc, km, kw, kb = jax.random.split(key, 5)
    query = jax.random.normal(kq, (B, Lq, D), dtype=jnp.float32)
    context = jax.random.normal(kc, (B, Ls, D), dtype=jnp.float32)
    matrix = jax.random.normal(km, (B, Lq, D), dtype=jnp.float32)
    # nn.Linear(embed_dim, sim_dim) params, deterministic init
    weight = 0.05 * jax.random.normal(kw, (SIM, D), dtype=jnp.float32)
    bias = 0.05 * jax.random.normal(kb, (SIM,), dtype=jnp.float32)

    out = alignment_vector(query, context, matrix, smooth, weight, bias)
    out = jax.block_until_ready(out)

    ref = _reference(query, context, matrix, smooth, weight, bias)
    assert out.shape == (B, Lq, SIM)
    max_err = float(jnp.max(jnp.abs(out - ref)))
    # bf16 MXU operands (f32 accumulation) => tolerance slightly above the f32 reference.
    assert jnp.allclose(out, ref, atol=3e-2, rtol=3e-2), f"mismatch vs reference: {max_err}"

    print("KERNEL_OK")
</pallas_src>

<mosaic_0001>
module attributes {stable_mosaic.version = 11 : i64} {
  func.func @_alignment_kernel(%arg0: i32, %arg1: memref<1x8x32xf32, #tpu.memory_space<vmem>>, %arg2: memref<1x16x32xf32, #tpu.memory_space<vmem>>, %arg3: memref<1x8x32xf32, #tpu.memory_space<vmem>>, %arg4: memref<32x128xbf16, #tpu.memory_space<vmem>>, %arg5: memref<1x128xf32, #tpu.memory_space<vmem>>, %arg6: memref<1x8x128xf32, #tpu.memory_space<vmem>>) attributes {dimension_semantics = [#tpu.dimension_semantics<parallel>], iteration_bounds = array<i64: 2>, scalar_prefetch = 0 : i64, scratch_operands = 0 : i64, tpu.core_type = #tpu.core_type<tc>, window_params = [{transform_indices = @transform_0, window_bounds = array<i64: 1, 8, 32>}, {transform_indices = @transform_1, window_bounds = array<i64: 1, 16, 32>}, {transform_indices = @transform_2, window_bounds = array<i64: 1, 8, 32>}, {pipeline_mode = #tpu.pipeline_mode<synchronous>, transform_indices = @transform_3, window_bounds = array<i64: 32, 128>}, {pipeline_mode = #tpu.pipeline_mode<synchronous>, transform_indices = @transform_4, window_bounds = array<i64: 1, 128>}, {transform_indices = @transform_5, window_bounds = array<i64: 1, 8, 128>}]} {
    %c0 = arith.constant 0 : index
    %c0_0 = arith.constant 0 : index
    %0 = vector.load %arg4[%c0, %c0_0] : memref<32x128xbf16, #tpu.memory_space<vmem>>, vector<32x128xbf16>
    %c0_1 = arith.constant 0 : index
    %c0_2 = arith.constant 0 : index
    %1 = vector.load %arg5[%c0_1, %c0_2] : memref<1x128xf32, #tpu.memory_space<vmem>>, vector<1x128xf32>
    %c0_i32 = arith.constant 0 : i32
    %2 = tpu.assume_multiple %c0_i32, 1 : i32
    %3 = arith.index_cast %2 : i32 to index
    %c0_3 = arith.constant 0 : index
    %c0_4 = arith.constant 0 : index
    %4 = vector.load %arg1[%3, %c0_3, %c0_4] : memref<1x8x32xf32, #tpu.memory_space<vmem>>, vector<1x8x32xf32>
    %5 = arith.index_cast %2 : i32 to index
    %c0_5 = arith.constant 0 : index
    %c0_6 = arith.constant 0 : index
    %6 = vector.load %arg3[%5, %c0_5, %c0_6] : memref<1x8x32xf32, #tpu.memory_space<vmem>>, vector<1x8x32xf32>
    %7 = arith.index_cast %2 : i32 to index
    %c0_7 = arith.constant 0 : index
    %c0_8 = arith.constant 0 : index
    %8 = vector.load %arg2[%7, %c0_7, %c0_8] : memref<1x16x32xf32, #tpu.memory_space<vmem>>, vector<1x16x32xf32>
    %9 = arith.truncf %8 : vector<1x16x32xf32> to vector<1x16x32xbf16>
    %10 = arith.mulf %4, %6 : vector<1x8x32xf32>
    %11 = arith.truncf %10 : vector<1x8x32xf32> to vector<1x8x32xbf16>
    %cst = arith.constant dense<0.000000e+00> : vector<1x8x16xf32>
    %12 = tpu.matmul %11, %9, %cst {dimension_numbers = #tpu.dot_dimension_numbers<[2], [2], [1], [1], [0, 0, 0, 1, 1, 1], [0], [0]>} : vector<1x8x32xbf16>, vector<1x16x32xbf16>, vector<1x8x16xf32> -> vector<1x8x16xf32>
    %cst_9 = arith.constant 0.000000e+00 : f32
    %13 = vector.broadcast %cst_9 : f32 to vector<1x8x16xf32>
    %14 = arith.cmpf ogt, %12, %13 : vector<1x8x16xf32>
    %cst_10 = arith.constant 1.000000e-01 : f32
    %15 = vector.broadcast %cst_10 : f32 to vector<1x8x16xf32>
    %16 = arith.mulf %15, %12 : vector<1x8x16xf32>
    %17 = arith.select %14, %12, %16 : vector<1x8x16xi1>, vector<1x8x16xf32>
    %18 = arith.mulf %17, %17 : vector<1x8x16xf32>
    %cst_11 = arith.constant dense<0.000000e+00> : vector<1x16xf32>
    %19 = vector.multi_reduction <add>, %18, %cst_11 [1] : vector<1x8x16xf32> to vector<1x16xf32>
    %20 = vector.shape_cast %19 : vector<1x16xf32> to vector<1x1x16xf32>
    %cst_12 = arith.constant 1.000000e-16 : f32
    %21 = vector.broadcast %cst_12 : f32 to vector<1x1x16xf32>
    %22 = arith.addf %20, %21 : vector<1x1x16xf32>
    %23 = math.rsqrt %22 : vector<1x1x16xf32>
    %cst_13 = arith.constant 9.000000e+00 : f32
    %24 = vector.broadcast %cst_13 : f32 to vector<1x1x16xf32>
    %25 = arith.mulf %23, %24 : vector<1x1x16xf32>
    %26 = vector.broadcast %25 : vector<1x1x16xf32> to vector<1x8x16xf32>
    %27 = arith.mulf %17, %26 : vector<1x8x16xf32>
    %28 = math.exp %27 : vector<1x8x16xf32>
    %cst_14 = arith.constant dense<0.000000e+00> : vector<1x8xf32>
    %29 = vector.multi_reduction <add>, %28, %cst_14 [2] : vector<1x8x16xf32> to vector<1x8xf32>
    %30 = vector.shape_cast %29 : vector<1x8xf32> to vector<1x8x1xf32>
    %31 = tpu.reciprocal %30 {approx = true} : vector<1x8x1xf32> -> vector<1x8x1xf32>
    %32 = vector.broadcast %31 : vector<1x8x1xf32> to vector<1x8x16xf32>
    %33 = arith.mulf %28, %32 : vector<1x8x16xf32>
    %34 = arith.truncf %33 : vector<1x8x16xf32> to vector<1x8x16xbf16>
    %cst_15 = arith.constant dense<0.000000e+00> : vector<1x8x32xf32>
    %35 = tpu.matmul %34, %9, %cst_15 {dimension_numbers = #tpu.dot_dimension_numbers<[2], [1], [1], [2], [0, 0, 0, 1, 1, 2], [0], [0]>} : vector<1x8x16xbf16>, vector<1x16x32xbf16>, vector<1x8x32xf32> -> vector<1x8x32xf32>
    %36 = arith.mulf %35, %35 : vector<1x8x32xf32>
    %cst_16 = arith.constant dense<0.000000e+00> : vector<1x8xf32>
    %37 = vector.multi_reduction <add>, %36, %cst_16 [2] : vector<1x8x32xf32> to vector<1x8xf32>
    %38 = vector.shape_cast %37 : vector<1x8xf32> to vector<1x8x1xf32>
    %cst_17 = arith.constant 1.000000e-16 : f32
    %39 = vector.broadcast %cst_17 : f32 to vector<1x8x1xf32>
    %40 = arith.addf %38, %39 : vector<1x8x1xf32>
    %41 = math.rsqrt %40 : vector<1x8x1xf32>
    %42 = vector.broadcast %41 : vector<1x8x1xf32> to vector<1x8x32xf32>
    %43 = arith.mulf %35, %42 : vector<1x8x32xf32>
    %44 = arith.subf %4, %43 : vector<1x8x32xf32>
    %45 = arith.mulf %44, %44 : vector<1x8x32xf32>
    %46 = vector.shape_cast %45 : vector<1x8x32xf32> to vector<8x32xf32>
    %47 = arith.truncf %46 : vector<8x32xf32> to vector<8x32xbf16>
    %cst_18 = arith.constant dense<0.000000e+00> : vector<8x128xf32>
    %48 = tpu.matmul %47, %0, %cst_18 {dimension_numbers = #tpu.dot_dimension_numbers<[1], [0], [0], [1], [0, 0, 1, 1], [], []>} : vector<8x32xbf16>, vector<32x128xbf16>, vector<8x128xf32> -> vector<8x128xf32>
    %49 = vector.broadcast %1 : vector<1x128xf32> to vector<8x128xf32>
    %50 = arith.addf %48, %49 : vector<8x128xf32>
    %51 = arith.mulf %50, %50 : vector<8x128xf32>
    %cst_19 = arith.constant dense<0.000000e+00> : vector<8xf32>
    %52 = vector.multi_reduction <add>, %51, %cst_19 [1] : vector<8x128xf32> to vector<8xf32>
    %53 = vector.shape_cast %52 : vector<8xf32> to vector<8x1xf32>
    %cst_20 = arith.constant 1.000000e-16 : f32
    %54 = vector.broadcast %cst_20 : f32 to vector<8x1xf32>
    %55 = arith.addf %53, %54 : vector<8x1xf32>
    %56 = math.rsqrt %55 : vector<8x1xf32>
    %57 = vector.broadcast %56 : vector<8x1xf32> to vector<8x128xf32>
    %58 = arith.mulf %50, %57 : vector<8x128xf32>
    %59 = vector.shape_cast %58 : vector<8x128xf32> to vector<1x8x128xf32>
    %60 = arith.index_cast %2 : i32 to index
    %c0_21 = arith.constant 0 : index
    %c0_22 = arith.constant 0 : index
    %61 = vector.load %arg6[%60, %c0_21, %c0_22] : memref<1x8x128xf32, #tpu.memory_space<vmem>>, vector<1x8x128xf32>
    tpu.vector_store %arg6[%60, %c0_21, %c0_22], %59 {strides = array<i32>} : memref<1x8x128xf32, #tpu.memory_space<vmem>>, vector<1x8x128xf32>,
    return
  }
  func.func @transform_0(%arg0: i32) -> (i32, i32, i32) {
    %c0_i32 = arith.constant 0 : i32
    %c0_i32_0 = arith.constant 0 : i32
    %c0_i32_1 = arith.constant 0 : i32
    return %arg0, %c0_i32, %c0_i32_0 : i32, i32, i32
  }
  func.func @transform_1(%arg0: i32) -> (i32, i32, i32) {
    %c0_i32 = arith.constant 0 : i32
    %c0_i32_0 = arith.constant 0 : i32
    %c0_i32_1 = arith.constant 0 : i32
    return %arg0, %c0_i32, %c0_i32_0 : i32, i32, i32
  }
  func.func @transform_2(%arg0: i32) -> (i32, i32, i32) {
    %c0_i32 = arith.constant 0 : i32
    %c0_i32_0 = arith.constant 0 : i32
    %c0_i32_1 = arith.constant 0 : i32
    return %arg0, %c0_i32, %c0_i32_0 : i32, i32, i32
  }
  func.func @transform_3(%arg0: i32) -> (i32, i32) {
    %c0_i32 = arith.constant 0 : i32
    %c0_i32_0 = arith.constant 0 : i32
    %c0_i32_1 = arith.constant 0 : i32
    return %c0_i32, %c0_i32_0 : i32, i32
  }
  func.func @transform_4(%arg0: i32) -> (i32, i32) {
    %c0_i32 = arith.constant 0 : i32
    %c0_i32_0 = arith.constant 0 : i32
    %c0_i32_1 = arith.constant 0 : i32
    return %c0_i32, %c0_i32_0 : i32, i32
  }
  func.func @transform_5(%arg0: i32) -> (i32, i32, i32) {
    %c0_i32 = arith.constant 0 : i32
    %c0_i32_0 = arith.constant 0 : i32
    %c0_i32_1 = arith.constant 0 : i32
    return %arg0, %c0_i32, %c0_i32_0 : i32, i32, i32
  }
}

</mosaic_0001>

<bundles_post_ra>
// kernel: tpu_custom_call.1
= control target key start
LH: loop header
LB: loop body
LE: loop exit
PB: predicated region body
PF: predicated region fallthrough
CT: control target
= control target key end

     0   :  { %s1347_s0 = inlined_call_operand.hbm [shape: f32[2,8,32], index: 0, kind: input, shape index: {}]   ;;  %s1348_s1 = inlined_call_operand.hbm [shape: f32[2,16,32], index: 1, kind: input, shape index: {}]   ;;  %s1349_s2 = inlined_call_operand.hbm [shape: f32[2,8,32], index: 2, kind: input, shape index: {}]   ;;  %s1350_s3 = inlined_call_operand.hbm [shape: bf16[32,128], index: 3, kind: input, shape index: {}]   ;;  %s1351_s4 = inlined_call_operand.vmem [shape: f32[1,128], index: 4, kind: input, shape index: {}]   ;;  %s1352_s5 = inlined_call_operand.hbm [shape: f32[2,8,128], index: 5, kind: output, shape index: {}]  }
   0x1   :  { %1368 = sst [smem:[#allocation19_spill]] %s1348_s1 }
   0x2   :  { %10 = vsyncpa [#allocation3], 0 }
   0x3   :  { %12 = vsyncpa [#allocation3 + $0x1], 0 }
   0x4   :  { %13 = vsyncpa [#allocation6], 0 }
   0x5   :  { %15 = vsyncpa [#allocation6 + $0x1], 0 }
   0x6   :  { %16 = vsyncpa [#allocation9], 0 }
   0x7   :  { %17 = vsyncpa [#allocation4], 0 }
   0x8   :  { %19 = vsyncpa [#allocation4 + $0x1], 0  ;;  %s1052_s18 = smov 0   ;;  %s1054_s19 = smov 0  }
   0x9   :  { %s1056_s20 = smov 0   ;;  %s1058_s21 = smov 0  }
   0xa LB: > { %1369 = sst [smem:[#allocation15_spill]] %s1005_s20  ;;  %s1073_s22 = sadd.s32 1, %s1009_s21   ;;  %s1009_s21 = sphi %s1058_s21, %s1395_s21   ;;  %s1005_s20 = sphi %s1056_s20, %s1397_s20   ;;  %s1001_s19 = sphi %s1054_s19, %s1399_s19   ;;  %s997_s18 = sphi %s1052_s18, %s1398_s18  }
   0xb   : > { %1370 = sst [smem:[#allocation16_spill]] %s1073_s22  ;;  %s32_s23 = sadd.s32 1, %s1005_s20 }
   0xc   : > { %s29_s24 = ssub.s32 %s1009_s21, %s1073_s22  ;;  %p1353_p0 = scmp.ne.s32.totalorder %s1005_s20, %s1001_s19 }
   0xd   : > { %p30_p1 = scmp.eq.s32.totalorder %s29_s24, 0  ;;  %p40_p2 = scmp.eq.s32.totalorder %s1009_s21, 0 }
   0xe   : > { %p763_p4 = scmp.lt.s32.totalorder %s1009_s21, 2  ;;  %s1090_s26 = sand.u32 1, %s1005_s20  }
   0xf   : > { %s1084_s25 = scalar_select %p30_p1, %s1005_s20, %s32_s23  }
  0x10   : > { %p41_p5 = por %p40_p2, %p1353_p0  ;;  %s223_s27 = sand.u32 1, %s1009_s21  }
  0x11   : > { %1371 = sst [smem:[#allocation17_spill]] %s1084_s25  ;;  %s683_s28 = sshll.u32 %s1090_s26, 4 }
  0x12   : > { %p1094_p6 = pnand %p763_p4, %p41_p5  ;;  %s704_s30 = sshll.u32 %s1009_s21, 8 }
  0x13   : > { %s1373_s1 = sld [smem:[#allocation19_spill]]  ;;  %s227_s9 = scalar_lea.vmem [#allocation5], %s683_s28 }
  0x14   : > { %s1372_s29 = scalar_select %p1094_p6, 1, 0 }
  0x15   : > { %s234_s10 = sshll.u32 %s227_s9, 4  ;;  %s1106_s11 = scalar_lea.sflag [#allocation6], %s223_s27  ;;  %s1104_s10 = int_to_ptr.vmem [resolvable:$true] %s234_s10 }
  0x16   : > { %p1112_p8 = pneg %p1094_p6 }
  0x18   : > { %s1374_s13 = scalar_select %p1112_p8, 1, 0 }
  0x19   : > { %s1102_s8 = scalar_lea.hbm %s1373_s1, %s704_s30  ;;  %s822_s16 = scalar_lea.hbm %s1373_s1, 512 }
  0x1a   : > { %s817_s12 = scalar_lea.hbm %s1102_s8, 256  ;;  %p823_p11 = scmp.lt.u32.totalorder %s1102_s8, %s1373_s1 }
  0x1b   : > { %p818_p7 = scmp.ne.s32.totalorder %s1102_s8, %s817_s12  ;;  %p824_p12 = scmp.lt.u32.totalorder %s822_s16, %s817_s12 }
  0x1c   : > { %p826_p1 = scmp.lt.u32.totalorder %s817_s12, %s1102_s8 }
  0x1d   : > { %p820_p9 = pnand %p1112_p8, %p818_p7  ;;  %p825_p13 = por %p824_p12, %p823_p11 }
  0x1f   : > { %p821_p10 = pneg %p820_p9  ;;  %p827_p2 = por %p826_p1, %p825_p13 }
  0x21   : > { %p828_p4 = pnand %p827_p2, %p821_p10 }
  0x23   : > { %831 = shalt.err (!%p828_p4)
}
  0x24   : > { %s832_s24 = scalar_lea.vmem %s1104_s10, 256  ;;  %s1011_s27 = smov [#allocation5]  }
  0x25   : > { %p833_p5 = scmp.ne.s32.totalorder %s1104_s10, %s832_s24  ;;  %s837_s28 = sshll.u32 %s1011_s27, 4  ;;  %s838_s28 = int_to_ptr.vmem [resolvable:$false] %s837_s28 }
  0x26   : > { %s839_s30 = scalar_lea.vmem %s838_s28, 512  ;;  %p840_p3 = scmp.lt.s32.totalorder %s1104_s10, %s838_s28 }
  0x27   : > { %p835_p7 = pnand %p833_p5, %p1112_p8  ;;  %p841_p0 = scmp.lt.s32.totalorder %s839_s30, %s832_s24 }
  0x29   : > { %p836_p9 = pneg %p835_p7  ;;  %p842_p11 = por %p841_p0, %p840_p3 }
  0x2b   : > { %p843_p12 = pnand %p842_p11, %p836_p9 }
  0x2d   : > { %846 = shalt.err (!%p843_p12)
}
  0x2e   : > { %s1012_s6 = smov 128   ;;  %s1013_s7 = smov 8  }
  0x2f   : > { %754 = dma.hbm_to_vmem [thread:$0]  (!%p1094_p6), %s1102_s8, 256, %s1104_s10, %s1106_s11, %s1012_s6, %s1012_s6, %s1013_s7  }
  0x30   : > { %s1137_s9 = sadd.s32 4294967295, %s1009_s21   ;;  %s677_s12 = sadd.s32 4294967294, %s1009_s21  }
  0x31   : > { %p45_p0 = scmp.ne.s32.totalorder %s1001_s19, %s997_s18  ;;  %p1357_p3 = scmp.eq.s32.totalorder %s1137_s9, 0 }
  0x32   : > { %p163_p10 = scmp.eq.s32.totalorder %s1137_s9, 1  ;;  %p169_p13 = scmp.eq.s32.totalorder %s677_s12, 1 }
  0x33   : > { %p1146_p1 = por %p1357_p3, %p45_p0  ;;  %p678_p2 = scmp.ge.s32.totalorder %s1009_s21, 1 }
  0x34   : > { %p1376_p4 = scmp.ne.s32.totalorder %s1005_s20, %s1001_s19  ;;  %p1158_p7 = por %p169_p13, %p45_p0 }
  0x35   : > { %s1375_s14 = scalar_select %p1146_p1, 1, 0 }
  0x36   : > { %p1154_p5 = por %p163_p10, %p1376_p4  ;;  %p176_p9 = scmp.lt.s32.totalorder %s1009_s21, 3 }
  0x37   : > { %s1378_s10 = scalar_select %p1158_p7, 1, 0 }
  0x38   : > { %s1377_s8 = scalar_select %p1154_p5, 1, 0 }
  0x39   : > { %1379 = sst [smem:[#allocation18_spill]] %s1378_s10  ;;  %p1163_p11 = pnand %p678_p2, %p176_p9 }
  0x3a   : > { %s1014_s16 = smov [#allocation8]   ;;  %s1365_s23 = sshll.u32 %s1090_s26, 3 }
  0x3b   : > { %s1380_s15 = scalar_select %p1163_p11, 1, 0 }
  0x3c   : > { %s188_s17 = sshll.u32 %s1014_s16, 4  ;;  %p744_p12 = pneg %p1163_p11  ;;  %s1167_s17 = int_to_ptr.vmem [resolvable:$true] %s188_s17 }
  0x3d   : > { %s1366_s24 = sshll.u32 %s1009_s21, 7  ;;  %s209_s7 = scalar_lea.vmem [#allocation2], %s1365_s23 }
  0x3e   : > { %p1175_p10 = pnand %p744_p12, %p1357_p3  ;;  %s1184_s6 = scalar_lea.hbm %s1347_s0, %s1366_s24 }
  0x3f   : > { %s216_s12 = sshll.u32 %s209_s7, 4  ;;  %s847_s25 = scalar_lea.hbm %s1350_s3, 256  ;;  %s1188_s12 = int_to_ptr.vmem [resolvable:$true] %s216_s12 }
  0x40   : > { %p848_p0 = scmp.ne.s32.totalorder %s1350_s3, %s847_s25  ;;  %p849_p13 = pneg %p1175_p10 }
  0x41   : > { %p854_p9 = scmp.lt.u32.totalorder %s847_s25, %s1350_s3 }
  0x42   : > { %p850_p2 = pnand %p849_p13, %p848_p0 }
  0x44   : > { %p851_p4 = pneg %p850_p2 }
  0x46   : > { %p856_p12 = pnand %p854_p9, %p851_p4 }
  0x48   : > { %859 = shalt.err (!%p856_p12)
}
  0x49   : > { %s860_s7 = scalar_lea.vmem %s1167_s17, 256  ;;  %p868_p1 = scmp.lt.s32.totalorder %s1167_s17, %s1167_s17 }
  0x4a   : > { %p861_p3 = scmp.ne.s32.totalorder %s1167_s17, %s860_s7  ;;  %p869_p11 = scmp.lt.s32.totalorder %s860_s7, %s860_s7 }
  0x4c   : > { %p863_p7 = pnand %p861_p3, %p849_p13  ;;  %p870_p6 = por %p869_p11, %p868_p1 }
  0x4e   : > { %p864_p5 = pneg %p863_p7 }
  0x50   : > { %p871_p8 = pnand %p870_p6, %p864_p5 }
  0x52   : > { %874 = shalt.err (!%p871_p8)
}
  0x53   : > { %s1015_s1 = smov 64   ;;  %s1016_s20 = smov 4  }
  0x54   : > { %747 = dma.hbm_to_vmem [thread:$0]  (!%p1175_p10), %s1350_s3, 256, %s1167_s17, [#allocation9], %s1015_s1, %s1015_s1, %s1016_s20  }
  0x55   : > { %s206_s16 = scalar_lea.sflag [#allocation3], %s1090_s26  ;;  %s875_s28 = scalar_lea.hbm %s1184_s6, 128 }
  0x56   : > { %p876_p3 = scmp.ne.s32.totalorder %s1184_s6, %s875_s28  ;;  %p1382_p6 = scmp.ne.s32.totalorder %s1374_s13, 0 }
  0x57   : > { %s880_s23 = scalar_lea.hbm %s1347_s0, 256  ;;  %p881_p5 = scmp.lt.u32.totalorder %s1184_s6, %s1347_s0 }
  0x58   : > { %p878_p8 = pnand %p876_p3, %p1382_p6  ;;  %p882_p7 = scmp.lt.u32.totalorder %s880_s23, %s875_s28 }
  0x59   : > { %p884_p0 = scmp.lt.u32.totalorder %s875_s28, %s1184_s6 }
  0x5a   : > { %p879_p1 = pneg %p878_p8  ;;  %p883_p11 = por %p882_p7, %p881_p5 }
  0x5c   : > { %p885_p13 = por %p884_p0, %p883_p11 }
  0x5e   : > { %p886_p2 = pnand %p885_p13, %p879_p1 }
  0x60   : > { %889 = shalt.err (!%p886_p2)
}
  0x61   : > { %s890_s17 = scalar_lea.vmem %s1188_s12, 128  ;;  %s1017_s27 = smov [#allocation2]  }
  0x62   : > { %p891_p10 = scmp.ne.s32.totalorder %s1188_s12, %s890_s17  ;;  %s895_s1 = sshll.u32 %s1017_s27, 4  ;;  %s896_s1 = int_to_ptr.vmem [resolvable:$false] %s895_s1 }
  0x63   : > { %s897_s10 = scalar_lea.vmem %s896_s1, 256  ;;  %p898_p12 = scmp.lt.s32.totalorder %s1188_s12, %s896_s1 }
  0x64   : > { %p893_p4 = pnand %p891_p10, %p1382_p6  ;;  %p899_p3 = scmp.lt.s32.totalorder %s897_s10, %s890_s17 }
  0x66   : > { %p894_p9 = pneg %p893_p4  ;;  %p900_p8 = por %p899_p3, %p898_p12 }
  0x68   : > { %p901_p5 = pnand %p900_p8, %p894_p9 }
  0x6a   : > { %904 = shalt.err (!%p901_p5)
}
  0x6b   : > { %p1383_p1 = scmp.ne.s32.totalorder %s1372_s29, 0  ;;  %s1384_s23 = sshll.u32 %s1009_s21, 7 }
  0x6c   : > { %s1238_s22 = scalar_lea.hbm %s1349_s2, %s1384_s23  ;;  %s1385_s25 = sshll.u32 %s1090_s26, 3 }
  0x6d   : > { %751 = dma.hbm_to_vmem [thread:$0]  (!%p1383_p1), %s1184_s6, 128, %s1188_s12, %s206_s16  }
  0x6e   : > { %s248_s28 = scalar_lea.vmem [#allocation7], %s1385_s25  ;;  %s905_s7 = scalar_lea.hbm %s1238_s22, 128 }
  0x6f   : > { %s255_s30 = sshll.u32 %s248_s28, 4  ;;  %p906_p7 = scmp.ne.s32.totalorder %s1238_s22, %s905_s7  ;;  %s256_s30 = int_to_ptr.vmem [resolvable:$true] %s255_s30 }
  0x70   : > { %s910_s16 = scalar_lea.hbm %s1349_s2, 256  ;;  %p911_p13 = scmp.lt.u32.totalorder %s1238_s22, %s1349_s2 }
  0x71   : > { %p908_p11 = pnand %p906_p7, %p1382_p6  ;;  %p912_p2 = scmp.lt.u32.totalorder %s910_s16, %s905_s7 }
  0x72   : > { %p914_p4 = scmp.lt.u32.totalorder %s905_s7, %s1238_s22 }
  0x73   : > { %p909_p0 = pneg %p908_p11  ;;  %p913_p10 = por %p912_p2, %p911_p13 }
  0x75   : > { %p915_p9 = por %p914_p4, %p913_p10 }
  0x77   : > { %p916_p12 = pnand %p915_p9, %p909_p0 }
  0x79   : > { %919 = shalt.err (!%p916_p12)
}
  0x7a   : > { %s920_s26 = scalar_lea.vmem %s256_s30, 128  ;;  %s1018_s1 = smov [#allocation7]  }
  0x7b   : > { %p921_p3 = scmp.ne.s32.totalorder %s256_s30, %s920_s26  ;;  %s925_s10 = sshll.u32 %s1018_s1, 4  ;;  %s926_s10 = int_to_ptr.vmem [resolvable:$false] %s925_s10 }
  0x7c   : > { %s927_s23 = scalar_lea.vmem %s926_s10, 256  ;;  %p928_p7 = scmp.lt.s32.totalorder %s256_s30, %s926_s10 }
  0x7d   : > { %p923_p8 = pnand %p921_p3, %p1382_p6  ;;  %p929_p11 = scmp.lt.s32.totalorder %s927_s23, %s920_s26 }
  0x7f   : > { %p924_p5 = pneg %p923_p8  ;;  %p930_p1 = por %p929_p11, %p928_p7 }
  0x81   : > { %p931_p2 = pnand %p930_p1, %p924_p5 }
  0x83   : > { %934 = shalt.err (!%p931_p2)
}
  0x84   : > { %p1386_p13 = scmp.ne.s32.totalorder %s1372_s29, 0  ;;  %p1387_p0 = scmp.ne.s32.totalorder %s1380_s15, 0 }
  0x85   : > { %s1263_s13 = sand.u32 (!%p1387_p0), 1, %s1001_s19   ;;  %p1388_p6 = scmp.ne.s32.totalorder (!%p1387_p0), %s1375_s14, 0 }
  0x86   : > { %757 = dma.hbm_to_vmem [thread:$0]  (!%p1386_p13), %s1238_s22, 128, %s256_s30, %s1106_s11  }
  0x87   : > { %264 = sbr.rel (%p1387_p0) target bundleno = 1343 (0x53f), region = 40  ;;  %s1266_s24 = sshll.u32 (!%p1387_p0), %s1263_s13, 3 }
  0x88   : > { %s267_s20 = scalar_lea.sflag (!%p1387_p0), [#allocation3], %s1263_s13  ;;  %s270_s25 = scalar_lea.vmem (!%p1387_p0), [#allocation2], %s1266_s24 }
  0x8e   : > { %980 = dma.done.wait (%p1388_p6), %s267_s20, 128  }
  0x8f   : > { %982 = vsyncadd (%p1388_p6), %s267_s20, 4294967168  ;;  %s275_s29 = sand.u32 1, %s1137_s9   ;;  %s690_s11 = sshll.u32 %s1263_s13, 4 }
  0x90   : > { %s276_s15 = scalar_lea.sflag [#allocation6], %s275_s29  ;;  %s279_s22 = scalar_lea.vmem [#allocation5], %s690_s11 }
  0x91   : > { %984 = dma.done.wait (%p1388_p6), %s276_s15, 384  }
  0x92   : > { %986 = vsyncadd (%p1388_p6), %s276_s15, 4294966912  ;;  %s288_s28 = scalar_lea.vmem [#allocation7], %s1266_s24  ;;  %p1389_p1 = scmp.eq.s32.totalorder %s1137_s9, 0 }
  0x94   : > { %988 = dma.done.wait (%p1389_p1), [#allocation9], 256   ;;  %p1390_p10 = pmov %p1389_p1 }
  0x95   : > { %v1019_v0 = vmov 0.0   ;;  %vm1020_vm0 = vmmov 0   ;;  %v342_v1 = vld [vmem:[%s279_s22] sm:$0xff]  ;;  %v343_v2 = vld [vmem:[%s279_s22 + $0x8] sm:$0xff]  ;;  %vm347_vm1 = vcmask 261120   ;;  %vm398_vm3 = vcmask 130048  }
  0x96   : > { %990 = vsyncadd (%p1390_p10), [#allocation9], 4294967040  ;;  %712 = vmatprep.subr.bf16.mxu0 %v1019_v0  ;;  %714 = vmatprep.mubr.msk.bf16.mxu0 %vm1020_vm0, %v1019_v0  ;;  %v337_v3 = vld [vmem:[%s270_s25] sm:$0xff]  ;;  %v344_v4 = vpack.c.bf16 %v343_v2, %v342_v1  ;;  %v339_v5 = vld [vmem:[%s288_s28] sm:$0xff]  ;;  %s701_s7 = sshll.u32 %s1137_s9, 7  ;;  %s328_s6 = scalar_lea.vmem [#allocation10], %s1266_s24 }
  0x97   : > { %718 = vmatprep.subr.bf16.mxu1 %v1019_v0  ;;  %720 = vmatprep.mubr.msk.bf16.mxu1 %vm1020_vm0, %v1019_v0  ;;  %v345_v7 = vmul.f32 %v339_v5, %v337_v3  ;;  %v805_v40 = vld [vmem:[#allocation8] sm:$0xff]   ;;  %v806_v41 = vld [vmem:[#allocation8 + $0x8] sm:$0xff]   ;;  %s554_s12 = sshll.u32 %s328_s6, 4  ;;  %s1303_s27 = scalar_lea.hbm %s1352_s5, %s701_s7  ;;  %s1305_s12 = int_to_ptr.vmem [resolvable:$true] %s554_s12 }
  0x98   : > { %v352_v6 = vsel %vm347_vm1, %v344_v4, 0  ;;  %719 = vmatpush3.bf16.msra.mxu1 %v344_v4  ;;  %v696_v49 = vld [vmem:[%s1351_s4] ss:$0 sm:$0xff]  ;;  %s541_s26 = scalar_lea.sflag [#allocation4], %s1263_s13  ;;  %s935_s1 = scalar_lea.vmem %s1305_s12, 128 }
  0x99   : > { %713 = vmatpush3.bf16.xpose.msra.mxu0 %v352_v6  ;;  %724 = vmatprep.subr.bf16.mxu1 %v1019_v0  ;;  %v346_v8 = vpack.c.bf16 %v345_v7, %v345_v7  ;;  %p936_p4 = scmp.ne.s32.totalorder %s1305_s12, %s935_s1  ;;  %p1391_p9 = scmp.ne.s32.totalorder %s1377_s8, 0 }
  0x9a   : > { %s1021_s9 = smov [#allocation10]  }
  0x9b   : > { %p937_p12 = pnand %p936_p4, %p1391_p9  ;;  %s939_s10 = sshll.u32 %s1021_s9, 4  ;;  %s940_s10 = int_to_ptr.vmem [resolvable:$false] %s939_s10 }
  0x9c   : > { %s941_s23 = scalar_lea.vmem %s940_s10, 256  ;;  %p942_p8 = scmp.lt.s32.totalorder %s1305_s12, %s940_s10 }
  0x9d   : > { %p938_p3 = pneg %p937_p12  ;;  %p943_p5 = scmp.lt.s32.totalorder %s941_s23, %s935_s1 }
  0x9f   : > { %p944_p7 = por %p943_p5, %p942_p8 }
  0xa0   : > { %715 = vmatmul.mubr.msk.bf16.vlgmr.msra.gmra.mrb[0].mxu0 %vm347_vm1, %v346_v8 }
  0xa1   : > { %p945_p11 = pnand %p944_p7, %p938_p3 }
 0x173   : > { %v388_v9 = vpop.f32.mrb[0].mxu0 }
 0x174   : > { %vm394_vm2 = vcmp.gt.f32.partialorder %v388_v9, 0.0  ;;  %v395_v10 = vmul.f32 0.1, %v388_v9  ;;  %v716_v11 = vpop.f32.mrb[1].mxu0 }
 0x175   : > { %v391_v12 = vpop.f32.mrb[2].mxu0 }
 0x176   : > { %v396_v13 = vsel %vm394_vm2, %v388_v9, %v395_v10  ;;  %v717_v14 = vpop.f32.mrb[3].mxu0 }
 0x177   : > { %v397_v15 = vmul.f32 %v396_v13, %v396_v13 }
 0x179   : > { %v399_v16 = vsel %vm398_vm3, %v397_v15, 0.0 }
 0x17a   : > { %v400_v17 = vrot.slane %v399_v16, 4 }
 0x17c   : > { %v401_v18 = vadd.f32 %v400_v17, %v399_v16 }
 0x17e   : > { %v402_v19 = vrot.slane %v401_v18, 2 }
 0x180   : > { %v403_v20 = vadd.f32 %v402_v19, %v401_v18 }
 0x182   : > { %v404_v21 = vrot.slane %v403_v20, 1 }
 0x184   : > { %v405_v22 = vadd.f32 %v404_v21, %v403_v20 }
 0x186   : > { %v406_v23 = vadd.f32 1e-16, %v405_v22 }
 0x188   : > { %807 = vrsqrt.f32 %v406_v23 }
 0x192   : > { %v808_v24 = vpop.eup %807 }
 0x193   : > { %v408_v25 = vmul.f32 9.0, %v808_v24 }
 0x195   : > { %v409_v26 = vmul.f32 %v408_v25, %v396_v13 }
 0x197   : > { %v410_v27 = vmul.f32 1.442695, %v409_v26 }
 0x199   : > { %809 = vpow2.f32 %v410_v27 }
 0x1a3   : > { %v810_v28 = vpop.eup %809 }
 0x1a4   : > { %v412_v29 = vsel %vm398_vm3, %v810_v28, 0.0 }
 0x1a5   : > { %413 = vadd.xlane.f32.xlu0 %v412_v29 }
 0x232   : > { %v414_v30 = vpop.xlane.xlu0 %413 }
 0x233   : > { %811 = vrcp.f32 %v414_v30 }
 0x23d   : > { %v812_v31 = vpop.eup %811 }
 0x23e   : > { %v416_v32 = vmul.f32 %v812_v31, %v810_v28 }
 0x240   : > { %v417_v33 = vpack.c.bf16 %v416_v32, %v416_v32 }
 0x242   : > { %721 = vmatmul.mubr.msk.bf16.vlgmr.msra.gmra.mrb[0].mxu1 %vm398_vm3, %v417_v33 }
 0x243   : > { %728 = vmatprep.mubr.msk.bf16.mxu1 %vm1020_vm0, %v1019_v0  ;;  %725 = vmatpush3.bf16.msra.mxu1 %v805_v40 }
 0x244   : > { %726 = vmatprep.subr.bf16.mxu1 %v1019_v0 }
 0x247   : > { %727 = vmatpush3.bf16.msra.mxu1 %v806_v41 }
 0x315   : > { %v455_v34 = vpop.f32.mrb[0].mxu1 }
 0x316   : > { %v461_v35 = vmul.f32 %v455_v34, %v455_v34  ;;  %v722_v36 = vpop.f32.mrb[1].mxu1 }
 0x317   : > { %v458_v37 = vpop.f32.mrb[2].mxu1 }
 0x318   : > { %v723_v38 = vpop.f32.mrb[3].mxu1  ;;  %v462_v39 = vsel %vm347_vm1, %v461_v35, 0.0 }
 0x319   : > { %463 = vadd.xlane.f32.xlu0 %v462_v39 }
 0x3a6   : > { %v464_v42 = vpop.xlane.xlu0 %463 }
 0x3a7   : > { %v465_v43 = vadd.f32 1e-16, %v464_v42 }
 0x3a9   : > { %813 = vrsqrt.f32 %v465_v43 }
 0x3b3   : > { %v814_v44 = vpop.eup %813 }
 0x3b4   : > { %v467_v45 = vmul.f32 %v814_v44, %v455_v34 }
 0x3b6   : > { %v468_v46 = vsub.f32 %v337_v3, %v467_v45 }
 0x3b8   : > { %v469_v47 = vmul.f32 %v468_v46, %v468_v46 }
 0x3ba   : > { %v470_v48 = vpack.c.bf16 %v469_v47, %v469_v47 }
 0x3bc   : > { %729 = vmatmul.mubr.msk.bf16.vlgmr.msra.gmra.mrb[4].mxu1 %vm347_vm1, %v470_v48 }
 0x48f   : > { %v526_v50 = vpop.f32.mrb[4].mxu1 }
 0x490   : > { %v527_v51 = vadd.f32 %v696_v49, %v526_v50  ;;  %v730_v52 = vpop.f32.mrb[5].mxu1 }
 0x491   : > { %v529_v53 = vpop.f32.mrb[6].mxu1 }
 0x492   : > { %v731_v54 = vpop.f32.mrb[7].mxu1  ;;  %v532_v55 = vmul.f32 %v527_v51, %v527_v51 }
 0x494   : > { %533 = vadd.xlane.f32.xlu1 %v532_v55 }
 0x521   : > { %v534_v56 = vpop.xlane.xlu1 %533 }
 0x522   : > { %v535_v57 = vadd.f32 1e-16, %v534_v56 }
 0x524   : > { %815 = vrsqrt.f32 %v535_v57 }
 0x52e   : > { %v816_v58 = vpop.eup %815 }
 0x52f   : > { %v537_v59 = vmul.f32 %v816_v58, %v527_v51 }
 0x531   : > { %539 = vst [vmem:[%s328_s6] sm:$0xff] %v537_v59 }
 0x532   : > { %948 = shalt.err (!%p945_p11)
}
 0x533   : > { %s949_s13 = scalar_lea.hbm %s1303_s27, 128  ;;  %s953_s25 = scalar_lea.hbm %s1352_s5, 256 }
 0x534   : > { %p950_p2 = scmp.ne.s32.totalorder %s1303_s27, %s949_s13  ;;  %p954_p6 = scmp.lt.u32.totalorder %s1303_s27, %s1352_s5 }
 0x535   : > { %p955_p1 = scmp.lt.u32.totalorder %s953_s25, %s949_s13  ;;  %p957_p4 = scmp.lt.u32.totalorder %s949_s13, %s1303_s27 }
 0x536   : > { %p951_p13 = pnand %p950_p2, %p1391_p9 }
 0x537   : > { %p956_p10 = por %p955_p1, %p954_p6 }
 0x538   : > { %p952_p0 = pneg %p951_p13 }
 0x539   : > { %p958_p12 = por %p957_p4, %p956_p10 }
 0x53b   : > { %p959_p3 = pnand %p958_p12, %p952_p0 }
 0x53d   : > { %962 = shalt.err (!%p959_p3)
}
 0x53e   : > { %742 = dma.vmem_to_hbm [thread:$0]  (%p1391_p9), %s1305_s12, 128, %s1303_s27, %s541_s26  }
 0x53f PF: > { %s1392_s15 = sld [smem:[#allocation18_spill]]  ;;  %s566_s22 = sand.u32 1, %s997_s18  }
 0x540   : > { %p1394_p5 = scmp.ge.s32.totalorder %s1009_s21, 2  ;;  %s567_s28 = scalar_lea.sflag [#allocation4], %s566_s22 }
 0x545   : > { %p1393_p8 = scmp.ne.s32.totalorder %s1392_s15, 0 }
 0x547   : > { %p759_p7 = pnand %p1394_p5, %p1393_p8 }
 0x549   : > { %992 = dma.done.wait (!%p759_p7), %s567_s28, 128  }
 0x54a   : > { %994 = vsyncadd (!%p759_p7), %s567_s28, 4294967168  ;;  %s1395_s21 = sld [smem:[#allocation16_spill]]  ;;  %s1396_s14 = sld [smem:[#allocation15_spill]] }
 0x54b   : > { %s1397_s20 = sld [smem:[#allocation17_spill]]  ;;  %s1398_s18 = smov %s1001_s19 }
 0x550   : > { %p22_p11 = scmp.ge.s32.totalorder %s1395_s21, 4   ;;  %s1399_s19 = smov %s1396_s14 }
 0x552   :  { %24 = sbr.rel (!%p22_p11) target bundleno = 10 (0xa), region = 117 }
 0x559   :  { %572 = vsyncpa [#allocation3], 1 }
 0x55a   :  { %574 = vsyncpa [#allocation3 + $0x1], 1 }
 0x55b   :  { %575 = vsyncpa [#allocation6], 1 }
 0x55c   :  { %577 = vsyncpa [#allocation6 + $0x1], 1 }
 0x55d   :  { %578 = vsyncpa [#allocation9], 1 }
 0x55e   :  { %579 = vsyncpa [#allocation4], 1 }
 0x55f   :  { %581 = vsyncpa [#allocation4 + $0x1], 1 }

</bundles_post_ra>
